<compile_context>
chip_gen: v6e
topology: v6e:2x2x1
jax: 0.10.0
libtpu: 0.0.40
codegen_flags: <defaults>
</compile_context>

<pallas_src>
import jax
import jax.numpy as jnp
from jax.experimental import pallas as pl
from jax.experimental.pallas import tpu as pltpu


_LANE = 128
_TM_CAP = 512    # single i-block (weight streamed once) for M <= 512
_TM_TILE = 256   # i-tile when M > _TM_CAP (weight re-stream unavoidable then)
_TN_CAP = 1024


# -----------------------------------------------------------------------------
# Kernel
# -----------------------------------------------------------------------------
def _linear_relu_kernel(x_ref, w_ref, b_ref, o_ref, acc_ref):
    """One (tm, tn) output tile of relu(x @ w + b); K reduction on grid axis 2."""
    k = pl.program_id(2)

    @pl.when(k == 0)
    def _():
        acc_ref[...] = jnp.zeros_like(acc_ref)

    # Cast LHS to the weight dtype inside the kernel (no-op when already bf16);
    # this lets layer 1 read the raw f32 input without a separate pad/cast pass.
    a = x_ref[...].astype(w_ref.dtype)
    acc_ref[...] += jnp.dot(a, w_ref[...], preferred_element_type=jnp.float32)

    @pl.when(k == pl.num_programs(2) - 1)
    def _():
        o_ref[...] = jnp.maximum(acc_ref[...] + b_ref[...], 0.0).astype(o_ref.dtype)


def _linear_relu(x, w, b, *, tm, tn, tk, out_dtype, vmem_limit):
    """relu(x @ w + b) on pre-padded operands; tiles exactly divide all dims."""
    Mp, Kp = x.shape
    Kp2, Np = w.shape
    assert Kp == Kp2 and Mp % tm == 0 and Kp % tk == 0 and Np % tn == 0

    grid = (Mp // tm, Np // tn, Kp // tk)

    x_item = jnp.dtype(x.dtype).itemsize
    w_item = jnp.dtype(w.dtype).itemsize
    out_item = jnp.dtype(out_dtype).itemsize

    cost = pl.CostEstimate(
        flops=2 * Mp * Kp * Np,
        transcendentals=0,
        bytes_accessed=(Mp * Kp * x_item + Kp * Np * w_item
                        + Mp * Np * out_item + Np * 4),
    )

    return pl.pallas_call(
        _linear_relu_kernel,
        out_shape=jax.ShapeDtypeStruct((Mp, Np), out_dtype),
        grid_spec=pltpu.PrefetchScalarGridSpec(
            num_scalar_prefetch=0,
            grid=grid,
            in_specs=[
                pl.BlockSpec((tm, tk), lambda i, j, k: (i, k)),
                pl.BlockSpec((tk, tn), lambda i, j, k: (k, j)),
                pl.BlockSpec((1, tn), lambda i, j, k: (0, j)),
            ],
            out_specs=pl.BlockSpec((tm, tn), lambda i, j, k: (i, j)),
            scratch_shapes=[pltpu.VMEM((tm, tn), jnp.float32)],
        ),
        compiler_params=pltpu.CompilerParams(
            dimension_semantics=("parallel", "parallel", "arbitrary"),
            vmem_limit_bytes=int(vmem_limit),
        ),
        cost_estimate=cost,
    )(x, w, b)


# -----------------------------------------------------------------------------
# Static planning / parameter preparation (done once, outside the hot path)
# -----------------------------------------------------------------------------
def _round_up(x, m):
    return -(-x // m) * m


def _divisor_tiles(p):
    """All multiples of 128 that exactly divide p (p is a 128-multiple)."""
    return [d for d in range(_LANE, p + 1, _LANE) if p % d == 0]


def _vmem_budget_bytes():
    """Generation-aware per-core VMEM budget (bytes)."""
    try:
        cap = int(pltpu.get_tpu_info().vmem_capacity_bytes)
    except Exception:
        cap = 64 << 20  # conservative fallback (safe on every generation)
    budget = min(cap * 3 // 4, 100 << 20)
    return max(budget, 32 << 20)


def _tensorcores_per_chip():
    """2 on v7x (two TensorCores / chip), 1 on v5e / v6e."""
    try:
        kind = jax.devices()[0].device_kind.lower().replace(" ", "")
    except Exception:
        return 1
    return 2 if ("v7" in kind or "tpu7" in kind) else 1


def _pick_tn(Np, split_for_megacore):
    """Lane-dense output tile; on 2-core chips split N so both cores work."""
    cands = _divisor_tiles(Np)
    cap = _TN_CAP
    if split_for_megacore and Np >= 2 * _LANE:
        cap = min(cap, Np // 2)
    fit = [d for d in cands if d <= cap]
    return max(fit) if fit else _LANE


def _pick_tk(Kp, tm, tn, x_item, w_item, out_item, budget):
    """Largest divisor of Kp keeping >= 4 (else >= 2, else 1) k-steps in budget."""
    def usage(tk):
        return (2 * tm * tk * x_item      # x double buffer
                + 2 * tk * tn * w_item    # w double buffer
                + 2 * tn * 4              # bias double buffer (f32)
                + 2 * tm * tn * out_item  # output double buffer
                + tm * tn * 4)            # f32 accumulator scratch

    cands = [d for d in _divisor_tiles(Kp) if usage(d) <= budget]
    if not cands:
        return _LANE
    for min_steps in (4, 2, 1):
        ok = [d for d in cands if Kp // d >= min_steps]
        if ok:
            return max(ok)
    return _LANE


def prepare_params(params, in_dim, compute_dtype=jnp.bfloat16,
                   input_dtype=jnp.float32, out_dtype=jnp.float32):
    """Pad/cast weights & biases once and build the static per-layer plan.

    params: list of (w_kn, b) with w_kn shaped (in_features, out_features).
    Returns (weights, biases, plan).
    """
    budget = _vmem_budget_bytes()
    split_n = _tensorcores_per_chip() >= 2
    w_item = jnp.dtype(compute_dtype).itemsize

    weights, biases, layers = [], [], []
    k_logical = in_dim
    Kp = _round_up(in_dim, _LANE)
    x_item = jnp.dtype(input_dtype).itemsize   # layer-1 may read raw f32 input
    num_layers = len(params)

    for idx, (w, b) in enumerate(params):
        kl, nl = w.shape
        assert kl == k_logical, "layer dims must chain"
        Np = _round_up(nl, _LANE)
        last = idx == num_layers - 1
        o_item = jnp.dtype(out_dtype if last else compute_dtype).itemsize

        tn = _pick_tn(Np, split_n)
        tk = _pick_tk(Kp, _TM_CAP, tn, x_item, w_item, o_item, budget)

        wp = (jnp.zeros((Kp, Np), compute_dtype)
              .at[:kl, :nl].set(w.astype(compute_dtype)))
        bp = (jnp.zeros((1, Np), jnp.float32)
              .at[0, :nl].set(b.astype(jnp.float32)))
        weights.append(wp)
        biases.append(bp)
        layers.append(dict(Kp=Kp, Np=Np, tk=tk, tn=tn, n_logical=nl))

        k_logical = nl
        Kp = Np
        x_item = jnp.dtype(compute_dtype).itemsize  # later layers read bf16

    plan = dict(layers=tuple(layers), in_dim=in_dim, vmem_limit=budget)
    return tuple(weights), tuple(biases), plan


def make_forward_fn(plan, compute_dtype=jnp.bfloat16, out_dtype=jnp.float32):
    """Builds a jitted forward: flatten -> (optional pad) -> FC+ReLU layers -> slice."""
    layers = plan["layers"]
    in_dim = plan["in_dim"]
    vmem_limit = plan["vmem_limit"]
    num_layers = len(layers)

    @jax.jit
    def forward(x, weights, biases):
        if x.ndim > 2:
            x = x.reshape(x.shape[0], -1)
        M, K = x.shape
        if K != in_dim:
            raise ValueError(
                f"flattened feature dim {K} does not match in_dim {in_dim}")

        Kp0 = layers[0]["Kp"]

        # Row tiling: a single i-block (weight streamed from HBM exactly once)
        # whenever M <= 512; only round M up to 16 when it is not 8-aligned.
        if M <= _TM_CAP:
            Mp = M if M % 8 == 0 else _round_up(M, 16)
            tm = Mp
        else:
            tm = _TM_TILE
            Mp = _round_up(M, tm)

        if Mp != M or Kp0 != K:
            # Zero padding contributes nothing to the matmuls.
            h = (jnp.zeros((Mp, Kp0), compute_dtype)
                 .at[:M, :K].set(x.astype(compute_dtype)))
        else:
            # No pad needed: pass the input as-is (layer-1 kernel casts on VPU).
            h = x

        for idx in range(num_layers):
            L = layers[idx]
            last = idx == num_layers - 1
            h = _linear_relu(
                h, weights[idx], biases[idx],
                tm=tm, tn=L["tn"], tk=L["tk"],
                out_dtype=out_dtype if last else compute_dtype,
                vmem_limit=vmem_limit,
            )

        n_final = layers[-1]["n_logical"]
        if Mp != M or h.shape[1] != n_final:
            h = h[:M, :n_final]
        return h

    return forward


# -----------------------------------------------------------------------------
# Parameter init (c2_xavier_fill-style: U(+-sqrt(3/fan_in)), zero bias)
# -----------------------------------------------------------------------------
def init_params(key, in_dim, fc_dim, num_fc):
    params = []
    d = in_dim
    for _ in range(num_fc):
        key, wk = jax.random.split(key)
        bound = (3.0 / d) ** 0.5
        w = jax.random.uniform(wk, (d, fc_dim), jnp.float32, -bound, bound)
        b = jnp.zeros((fc_dim,), jnp.float32)
        params.append((w, b))
        d = fc_dim
    return params


if __name__ == "__main__":
    # Small shapes consistent with the module: pooled ROI features (N, C, H, W).
    N, C, H, W = 2, 4, 16, 16
    NUM_FC, FC_DIM = 2, 128
    IN_DIM = C * H * W

    key = jax.random.PRNGKey(0)
    key, xk = jax.random.split(key)
    x = jax.random.normal(xk, (N, C, H, W), jnp.float32)

    params = init_params(key, IN_DIM, FC_DIM, NUM_FC)

    compute_dtype = jnp.bfloat16
    weights, biases, plan = prepare_params(params, IN_DIM, compute_dtype)
    forward = make_forward_fn(plan, compute_dtype=compute_dtype, out_dtype=jnp.float32)

    out = forward(x, weights, biases)
    out = jax.block_until_ready(out)
    assert out.shape == (N, FC_DIM), out.shape

    # Reference 1: f32 math (the PyTorch module's semantics); loose tolerance
    # because the kernel uses bf16 operands with f32 accumulation.
    ref_f32 = x.reshape(N, -1)
    for w, b in params:
        ref_f32 = jnp.maximum(ref_f32 @ w + b, 0.0)
    assert jnp.allclose(out, ref_f32, atol=1e-1, rtol=5e-2), "mismatch vs f32 reference"

    # Reference 2: emulate the kernel's bf16-operand / f32-accumulate path.
    ref_bf = x.reshape(N, -1)
    for i, (w, b) in enumerate(params):
        acc = jnp.dot(
            ref_bf.astype(jnp.bfloat16),
            w.astype(jnp.bfloat16),
            preferred_element_type=jnp.float32,
        )
        act = jnp.maximum(acc + b, 0.0)
        ref_bf = act.astype(jnp.bfloat16) if i < len(params) - 1 else act
    assert jnp.allclose(out, ref_bf, atol=2e-2, rtol=2e-2), "mismatch vs bf16 reference"

    print("KERNEL_OK")
</pallas_src>

<mosaic_0001>
module attributes {stable_mosaic.version = 11 : i64} {
  func.func @_linear_relu_kernel(%arg0: i32, %arg1: i32, %arg2: i32, %arg3: memref<16x256xbf16, #tpu.memory_space<vmem>>, %arg4: memref<256x128xbf16, #tpu.memory_space<vmem>>, %arg5: memref<1x128xf32, #tpu.memory_space<vmem>>, %arg6: memref<16x128xbf16, #tpu.memory_space<vmem>>, %arg7: memref<16x128xf32, #tpu.memory_space<vmem>>) attributes {dimension_semantics = [#tpu.dimension_semantics<parallel>, #tpu.dimension_semantics<parallel>, #tpu.dimension_semantics<arbitrary>], iteration_bounds = array<i64: 1, 1, 4>, scalar_prefetch = 0 : i64, scratch_operands = 1 : i64, tpu.core_type = #tpu.core_type<tc>, window_params = [{transform_indices = @transform_0, window_bounds = array<i64: 16, 256>}, {transform_indices = @transform_1, window_bounds = array<i64: 256, 128>}, {transform_indices = @transform_2, window_bounds = array<i64: 1, 128>}, {transform_indices = @transform_3, window_bounds = array<i64: 16, 128>}]} {
    %c0_i32 = arith.constant 0 : i32
    %0 = arith.cmpi eq, %arg2, %c0_i32 : i32
    %1 = arith.extui %0 : i1 to i32
    %c0_i32_0 = arith.constant 0 : i32
    %2 = arith.cmpi ne, %1, %c0_i32_0 : i32
    scf.if %2 {
      %cst_9 = arith.constant 0.000000e+00 : f32
      %12 = vector.broadcast %cst_9 : f32 to vector<16x128xf32>
      %c0_10 = arith.constant 0 : index
      %c0_11 = arith.constant 0 : index
      %13 = vector.load %arg7[%c0_10, %c0_11] : memref<16x128xf32, #tpu.memory_space<vmem>>, vector<16x128xf32>
      tpu.vector_store %arg7[%c0_10, %c0_11], %12 {strides = array<i32>} : memref<16x128xf32, #tpu.memory_space<vmem>>, vector<16x128xf32>,
    } else {
    }
    %c0 = arith.constant 0 : index
    %c0_1 = arith.constant 0 : index
    %3 = vector.load %arg3[%c0, %c0_1] : memref<16x256xbf16, #tpu.memory_space<vmem>>, vector<16x256xbf16>
    %c0_2 = arith.constant 0 : index
    %c0_3 = arith.constant 0 : index
    %4 = vector.load %arg7[%c0_2, %c0_3] : memref<16x128xf32, #tpu.memory_space<vmem>>, vector<16x128xf32>
    %c0_4 = arith.constant 0 : index
    %c0_5 = arith.constant 0 : index
    %5 = vector.load %arg4[%c0_4, %c0_5] : memref<256x128xbf16, #tpu.memory_space<vmem>>, vector<256x128xbf16>
    %cst = arith.constant dense<0.000000e+00> : vector<16x128xf32>
    %6 = tpu.matmul %3, %5, %cst {dimension_numbers = #tpu.dot_dimension_numbers<[1], [0], [0], [1], [0, 0, 1, 1], [], []>} : vector<16x256xbf16>, vector<256x128xbf16>, vector<16x128xf32> -> vector<16x128xf32>
    %7 = arith.addf %4, %6 : vector<16x128xf32>
    %c0_6 = arith.constant 0 : index
    %c0_7 = arith.constant 0 : index
    %8 = vector.load %arg7[%c0_6, %c0_7] : memref<16x128xf32, #tpu.memory_space<vmem>>, vector<16x128xf32>
    tpu.vector_store %arg7[%c0_6, %c0_7], %7 {strides = array<i32>} : memref<16x128xf32, #tpu.memory_space<vmem>>, vector<16x128xf32>,
    %c3_i32 = arith.constant 3 : i32
    %9 = arith.cmpi eq, %arg2, %c3_i32 : i32
    %10 = arith.extui %9 : i1 to i32
    %c0_i32_8 = arith.constant 0 : i32
    %11 = arith.cmpi ne, %10, %c0_i32_8 : i32
    scf.if %11 {
      %c0_9 = arith.constant 0 : index
      %c0_10 = arith.constant 0 : index
      %12 = vector.load %arg7[%c0_9, %c0_10] : memref<16x128xf32, #tpu.memory_space<vmem>>, vector<16x128xf32>
      %c0_11 = arith.constant 0 : index
      %c0_12 = arith.constant 0 : index
      %13 = vector.load %arg5[%c0_11, %c0_12] : memref<1x128xf32, #tpu.memory_space<vmem>>, vector<1x128xf32>
      %14 = vector.broadcast %13 : vector<1x128xf32> to vector<16x128xf32>
      %15 = arith.addf %12, %14 : vector<16x128xf32>
      %cst_13 = arith.constant 0.000000e+00 : f32
      %16 = vector.broadcast %cst_13 : f32 to vector<16x128xf32>
      %17 = arith.maximumf %15, %16 : vector<16x128xf32>
      %18 = arith.truncf %17 : vector<16x128xf32> to vector<16x128xbf16>
      %c0_14 = arith.constant 0 : index
      %c0_15 = arith.constant 0 : index
      %19 = vector.load %arg6[%c0_14, %c0_15] : memref<16x128xbf16, #tpu.memory_space<vmem>>, vector<16x128xbf16>
      tpu.vector_store %arg6[%c0_14, %c0_15], %18 {strides = array<i32>} : memref<16x128xbf16, #tpu.memory_space<vmem>>, vector<16x128xbf16>,
    } else {
    }
    return
  }
  func.func @transform_0(%arg0: i32, %arg1: i32, %arg2: i32) -> (i32, i32) {
    %c0_i32 = arith.constant 0 : i32
    return %arg0, %arg2 : i32, i32
  }
  func.func @transform_1(%arg0: i32, %arg1: i32, %arg2: i32) -> (i32, i32) {
    %c0_i32 = arith.constant 0 : i32
    return %arg2, %arg1 : i32, i32
  }
  func.func @transform_2(%arg0: i32, %arg1: i32, %arg2: i32) -> (i32, i32) {
    %c0_i32 = arith.constant 0 : i32
    %c0_i32_0 = arith.constant 0 : i32
    return %c0_i32, %arg1 : i32, i32
  }
  func.func @transform_3(%arg0: i32, %arg1: i32, %arg2: i32) -> (i32, i32) {
    %c0_i32 = arith.constant 0 : i32
    return %arg0, %arg1 : i32, i32
  }
}

module attributes {stable_mosaic.version = 11 : i64} {
  func.func @_linear_relu_kernel(%arg0: i32, %arg1: i32, %arg2: i32, %arg3: memref<16x128xbf16, #tpu.memory_space<vmem>>, %arg4: memref<128x128xbf16, #tpu.memory_space<vmem>>, %arg5: memref<1x128xf32, #tpu.memory_space<vmem>>, %arg6: memref<16x128xf32, #tpu.memory_space<vmem>>, %arg7: memref<16x128xf32, #tpu.memory_space<vmem>>) attributes {dimension_semantics = [#tpu.dimension_semantics<parallel>, #tpu.dimension_semantics<parallel>, #tpu.dimension_semantics<arbitrary>], iteration_bounds = array<i64: 1, 1, 1>, scalar_prefetch = 0 : i64, scratch_operands = 1 : i64, tpu.core_type = #tpu.core_type<tc>, window_params = [{transform_indices = @transform_0, window_bounds = array<i64: 16, 128>}, {transform_indices = @transform_1, window_bounds = array<i64: 128, 128>}, {transform_indices = @transform_2, window_bounds = array<i64: 1, 128>}, {transform_indices = @transform_3, window_bounds = array<i64: 16, 128>}]} {
    %c0_i32 = arith.constant 0 : i32
    %0 = arith.cmpi eq, %arg2, %c0_i32 : i32
    %1 = arith.extui %0 : i1 to i32
    %c0_i32_0 = arith.constant 0 : i32
    %2 = arith.cmpi ne, %1, %c0_i32_0 : i32
    scf.if %2 {
      %cst_10 = arith.constant 0.000000e+00 : f32
      %12 = vector.broadcast %cst_10 : f32 to vector<16x128xf32>
      %c0_11 = arith.constant 0 : index
      %c0_12 = arith.constant 0 : index
      %13 = vector.load %arg7[%c0_11, %c0_12] : memref<16x128xf32, #tpu.memory_space<vmem>>, vector<16x128xf32>
      tpu.vector_store %arg7[%c0_11, %c0_12], %12 {strides = array<i32>} : memref<16x128xf32, #tpu.memory_space<vmem>>, vector<16x128xf32>,
    } else {
    }
    %c0 = arith.constant 0 : index
    %c0_1 = arith.constant 0 : index
    %3 = vector.load %arg3[%c0, %c0_1] : memref<16x128xbf16, #tpu.memory_space<vmem>>, vector<16x128xbf16>
    %c0_2 = arith.constant 0 : index
    %c0_3 = arith.constant 0 : index
    %4 = vector.load %arg7[%c0_2, %c0_3] : memref<16x128xf32, #tpu.memory_space<vmem>>, vector<16x128xf32>
    %c0_4 = arith.constant 0 : index
    %c0_5 = arith.constant 0 : index
    %5 = vector.load %arg4[%c0_4, %c0_5] : memref<128x128xbf16, #tpu.memory_space<vmem>>, vector<128x128xbf16>
    %cst = arith.constant dense<0.000000e+00> : vector<16x128xf32>
    %6 = tpu.matmul %3, %5, %cst {dimension_numbers = #tpu.dot_dimension_numbers<[1], [0], [0], [1], [0, 0, 1, 1], [], []>} : vector<16x128xbf16>, vector<128x128xbf16>, vector<16x128xf32> -> vector<16x128xf32>
    %7 = arith.addf %4, %6 : vector<16x128xf32>
    %c0_6 = arith.constant 0 : index
    %c0_7 = arith.constant 0 : index
    %8 = vector.load %arg7[%c0_6, %c0_7] : memref<16x128xf32, #tpu.memory_space<vmem>>, vector<16x128xf32>
    tpu.vector_store %arg7[%c0_6, %c0_7], %7 {strides = array<i32>} : memref<16x128xf32, #tpu.memory_space<vmem>>, vector<16x128xf32>,
    %c0_i32_8 = arith.constant 0 : i32
    %9 = arith.cmpi eq, %arg2, %c0_i32_8 : i32
    %10 = arith.extui %9 : i1 to i32
    %c0_i32_9 = arith.constant 0 : i32
    %11 = arith.cmpi ne, %10, %c0_i32_9 : i32
    scf.if %11 {
      %c0_10 = arith.constant 0 : index
      %c0_11 = arith.constant 0 : index
      %12 = vector.load %arg7[%c0_10, %c0_11] : memref<16x128xf32, #tpu.memory_space<vmem>>, vector<16x128xf32>
      %c0_12 = arith.constant 0 : index
      %c0_13 = arith.constant 0 : index
      %13 = vector.load %arg5[%c0_12, %c0_13] : memref<1x128xf32, #tpu.memory_space<vmem>>, vector<1x128xf32>
      %14 = vector.broadcast %13 : vector<1x128xf32> to vector<16x128xf32>
      %15 = arith.addf %12, %14 : vector<16x128xf32>
      %cst_14 = arith.constant 0.000000e+00 : f32
      %16 = vector.broadcast %cst_14 : f32 to vector<16x128xf32>
      %17 = arith.maximumf %15, %16 : vector<16x128xf32>
      %c0_15 = arith.constant 0 : index
      %c0_16 = arith.constant 0 : index
      %18 = vector.load %arg6[%c0_15, %c0_16] : memref<16x128xf32, #tpu.memory_space<vmem>>, vector<16x128xf32>
      tpu.vector_store %arg6[%c0_15, %c0_16], %17 {strides = array<i32>} : memref<16x128xf32, #tpu.memory_space<vmem>>, vector<16x128xf32>,
    } else {
    }
    return
  }
  func.func @transform_0(%arg0: i32, %arg1: i32, %arg2: i32) -> (i32, i32) {
    %c0_i32 = arith.constant 0 : i32
    return %arg0, %arg2 : i32, i32
  }
  func.func @transform_1(%arg0: i32, %arg1: i32, %arg2: i32) -> (i32, i32) {
    %c0_i32 = arith.constant 0 : i32
    return %arg2, %arg1 : i32, i32
  }
  func.func @transform_2(%arg0: i32, %arg1: i32, %arg2: i32) -> (i32, i32) {
    %c0_i32 = arith.constant 0 : i32
    %c0_i32_0 = arith.constant 0 : i32
    return %c0_i32, %arg1 : i32, i32
  }
  func.func @transform_3(%arg0: i32, %arg1: i32, %arg2: i32) -> (i32, i32) {
    %c0_i32 = arith.constant 0 : i32
    return %arg0, %arg1 : i32, i32
  }
}

</mosaic_0001>

<bundles_post_ra>
// kernel: forward.2
= control target key start
LH: loop header
LB: loop body
LE: loop exit
PB: predicated region body
PF: predicated region fallthrough
CT: control target
= control target key end

     0   :  { %8 = vsyncpa [#allocation5], 0  ;;  %s1013_s0 = inlined_call_operand.vmem [shape: bf16[16,1024], index: 0, kind: input, shape index: {}]   ;;  %s1014_s1 = inlined_call_operand.hbm [shape: bf16[1024,128], index: 1, kind: input, shape index: {}]   ;;  %s1015_s2 = inlined_call_operand.vmem [shape: f32[1,128], index: 2, kind: input, shape index: {}]   ;;  %s1016_s3 = inlined_call_operand.vmem [shape: bf16[16,128], index: 3, kind: output, shape index: {}]  }
   0x1   :  { %10 = vsyncpa [#allocation5 + $0x1], 0  ;;  %s891_s12 = smov 0   ;;  %s893_s13 = smov 0  }
   0x2   :  { %s895_s14 = smov 0   ;;  %s897_s15 = smov 0  }
   0x3   :  { %s899_s16 = smov 0   ;;  %s901_s17 = smov 0  }
   0x4 LB: > { %s646_s18 = sadd.s32 4294967295, %s865_s17   ;;  %s28_s19 = sadd.s32 1, %s861_s16  ;;  %s865_s17 = sphi %s901_s17, %s16_s17   ;;  %s861_s16 = sphi %s899_s16, %s1023_s16   ;;  %s857_s15 = sphi %s897_s15, %s1022_s15   ;;  %s853_s14 = sphi %s895_s14, %s1021_s14   ;;  %s849_s13 = sphi %s893_s13, %s1020_s13   ;;  %s845_s12 = sphi %s891_s12, %s1019_s12  }
   0x5   : > { %p29_p0 = scmp.ge.s32.totalorder %s28_s19, 4  ;;  %s44_s20 = sadd.s32 1, %s853_s14 }
   0x6   : > { %p51_p1 = scmp.ne.s32.totalorder %s853_s14, %s849_s13  ;;  %p52_p2 = scmp.eq.s32.totalorder %s865_s17, 0 }
   0x7   : > { %s1025_s19 = smov (%p29_p0, %s28_s19), 0  ;;  %p85_p4 = scmp.ne.s32.totalorder %s849_s13, %s845_s12 }
   0x8   : > { %p927_p3 = por %p52_p2, %p51_p1  ;;  %s40_s22 = ssub.s32 %s861_s16, %s1025_s19 }
   0x9   : > { %p86_p5 = scmp.eq.s32.totalorder %s646_s18, 0  ;;  %p42_p6 = scmp.eq.s32.totalorder %s40_s22, 0 }
   0xa   : > { %p649_p8 = scmp.ge.s32.totalorder %s865_s17, 4 }
   0xb   : > { %p934_p7 = por %p86_p5, %p85_p4 }
   0xc   : > { %s939_s24 = scalar_select %p42_p6, %s853_s14, %s44_s20  }
   0xd   : > { %165 = sbr.rel (%p649_p8) target bundleno = 40 (0x28), region = 20 }
  0x12   : > { %168 = sbr.rel (!%p927_p3) target bundleno = 24 (0x18), region = 24  ;;  %s170_s25 = sand.u32 (%p927_p3), 1, %s853_s14  }
  0x13   : > { %s686_s26 = sshll.u32 (%p927_p3), %s861_s16, 3  ;;  %s650_s27 = sshll.u32 (%p927_p3), %s170_s25, 4 }
  0x14   : > { %s178_s30 = scalar_lea.vmem (%p927_p3), %s1013_s0, %s686_s26  ;;  %s172_s4 = scalar_lea.vmem (%p927_p3), [#allocation3], %s650_s27 }
  0x15   : > { %v209_v0 = vld [vmem:[%s178_s30] sm:$0xff] (%p927_p3) }
  0x16   : > { %v211_v1 = vld [vmem:[%s178_s30 + $0x20] sm:$0xff] (%p927_p3)  ;;  %210 = vst [vmem:[%s172_s4] sm:$0xff] (%p927_p3), %v209_v0 }
  0x17   : > { %212 = vst [vmem:[%s172_s4 + $0x8] sm:$0xff] %v211_v1 }
  0x18 PF: > { %s219_s5 = sand.u32 1, %s853_s14   ;;  %s687_s6 = sshll.u32 %s861_s16, 11 }
  0x19   : > { %s653_s7 = sshll.u32 %s219_s5, 7  ;;  %s230_s10 = scalar_lea.hbm %s1014_s1, %s687_s6 }
  0x1a   : > { %s223_s11 = scalar_lea.vmem [#allocation4], %s653_s7  ;;  %s220_s18 = scalar_lea.sflag [#allocation5], %s219_s5 }
  0x1b   : > { %s231_s12 = sshll.u32 %s223_s11, 4  ;;  %s867_s22 = smov [#allocation4]   ;;  %s232_s12 = int_to_ptr.vmem [resolvable:$true] %s231_s12 }
  0x1c   : > { %s801_s20 = scalar_lea.vmem %s232_s12, 2048  ;;  %s805_s25 = sshll.u32 %s867_s22, 4  ;;  %s806_s25 = int_to_ptr.vmem [resolvable:$false] %s805_s25 }
  0x1d   : > { %p802_p9 = scmp.ne.s32.totalorder %s232_s12, %s801_s20  ;;  %s807_s26 = scalar_lea.vmem %s806_s25, 4096 }
  0x1e   : > { %p808_p12 = scmp.lt.s32.totalorder %s232_s12, %s806_s25  ;;  %p809_p13 = scmp.lt.s32.totalorder %s807_s26, %s801_s20 }
  0x1f   : > { %p803_p10 = pnand %p802_p9, %p927_p3 }
  0x20   : > { %p810_p0 = por %p809_p13, %p808_p12 }
  0x21   : > { %p804_p11 = pneg %p803_p10 }
  0x23   : > { %p811_p1 = pnand %p810_p0, %p804_p11 }
  0x25   : > { %814 = shalt.err (!%p811_p1)
}
  0x26   : > { %s868_s27 = smov 64   ;;  %s869_s28 = smov 4  }
  0x27   : > { %717 = dma.hbm_to_vmem [thread:$0]  (%p927_p3), %s230_s10, 2048, %s232_s12, %s220_s18, %s868_s27, %s868_s27, %s869_s28  }
  0x28 PF: > { %p656_p2 = scmp.ge.s32.totalorder %s865_s17, 1  ;;  %p239_p4 = scmp.lt.s32.totalorder %s865_s17, 5 }
  0x2a   : > { %p240_p5 = pnand %p656_p2, %p239_p4 }
  0x2b   : > { %s246_s29 = sand.u32 (!%p240_p5), 1, %s849_s13  }
  0x2c   : > { %243 = sbr.rel (%p240_p5) target bundleno = 310 (0x136), region = 66  ;;  %s657_s30 = sshll.u32 (!%p240_p5), %s246_s29, 4 }
  0x2d   : > { %s658_s4 = sshll.u32 (!%p240_p5), %s246_s29, 7  ;;  %s961_s5 = scalar_lea.vmem (!%p240_p5), [#allocation3], %s657_s30 }
  0x2e   : > { %s253_s6 = scalar_lea.sflag (!%p240_p5), [#allocation5], %s246_s29  ;;  %s963_s7 = scalar_lea.vmem (!%p240_p5), [#allocation4], %s658_s4 }
  0x31   : > { %840 = dma.done.wait (%p934_p7), %s253_s6, 2048  }
  0x32   : > { %842 = vsyncadd (%p934_p7), %s253_s6, 4294965248  ;;  %p659_p3 = scmp.ne.s32.totalorder %s857_s15, 0 }
  0x34   : > { %308 = sbr.rel (%p659_p3) target bundleno = 59 (0x3b), region = 78 }
  0x39   : > { %v870_v2 = vmov 0.0  }
  0x3a   : > { %309 = vst [vmem:[#allocation2] sm:$0xff] %v870_v2  ;;  %310 = vst [vmem:[#allocation2 + $0x8] sm:$0xff] %v870_v2 }
  0x3b PF: > { %v770_v3 = vld [vmem:[%s963_s7 + $0x78] sm:$0xff]   ;;  %v772_v5 = vld [vmem:[%s963_s7 + $0x70] sm:$0xff]   ;;  %v774_v7 = vld [vmem:[%s963_s7 + $0x68] sm:$0xff]   ;;  %p678_p6 = scmp.ne.s32.totalorder %s857_s15, 3 }
  0x3c   : > { %v771_v4 = vld [vmem:[%s963_s7 + $0x38] sm:$0xff]   ;;  %695 = vmatprep.subr.bf16.mxu0 %v770_v3  ;;  %v773_v6 = vld [vmem:[%s963_s7 + $0x30] sm:$0xff]   ;;  %v775_v8 = vld [vmem:[%s963_s7 + $0x28] sm:$0xff]  }
  0x3d   : > { %696 = vmatpush3.bf16.msra.mxu0 %v771_v4  ;;  %v776_v9 = vld [vmem:[%s963_s7 + $0x60] sm:$0xff]   ;;  %v778_v11 = vld [vmem:[%s963_s7 + $0x58] sm:$0xff]   ;;  %v780_v13 = vld [vmem:[%s963_s7 + $0x50] sm:$0xff]  }
  0x3e   : > { %697 = vmatprep.subr.bf16.mxu0 %v772_v5  ;;  %v777_v10 = vld [vmem:[%s963_s7 + $0x20] sm:$0xff]   ;;  %v779_v12 = vld [vmem:[%s963_s7 + $0x18] sm:$0xff]   ;;  %v781_v15 = vld [vmem:[%s963_s7 + $0x10] sm:$0xff]  }
  0x3f   : > { %v788_v14 = vld [vmem:[%s961_s5 + $0x4] ss:$8 sps:$4 sm:$0xff]   ;;  %v786_v20 = vld [vmem:[%s961_s5] ss:$8 sps:$4 sm:$0xff]  }
  0x40   : > { %485 = vmatprep.mubr.bf16.mxu0 %v788_v14  ;;  %v782_v16 = vld [vmem:[%s963_s7 + $0x48] sm:$0xff]   ;;  %v784_v18 = vld [vmem:[%s963_s7 + $0x40] sm:$0xff]  }
  0x41   : > { %698 = vmatpush3.bf16.msra.mxu0 %v773_v6  ;;  %v783_v17 = vld [vmem:[%s963_s7 + $0x8] sm:$0xff]   ;;  %v785_v19 = vld [vmem:[%s963_s7] sm:$0xff]   ;;  %v313_v22 = vld [vmem:[#allocation2] sm:$0xff] }
  0x42   : > { %699 = vmatprep.subr.bf16.mxu0 %v774_v7  ;;  %v314_v27 = vld [vmem:[#allocation2 + $0x8] sm:$0xff] }
  0x45   : > { %700 = vmatpush3.bf16.msra.mxu0 %v775_v8 }
  0x46   : > { %701 = vmatprep.subr.bf16.mxu0 %v776_v9 }
  0x49   : > { %702 = vmatpush3.bf16.msra.mxu0 %v777_v10 }
  0x4a   : > { %703 = vmatprep.subr.bf16.mxu0 %v778_v11 }
  0x4d   : > { %704 = vmatpush3.bf16.msra.mxu0 %v779_v12 }
  0x4e   : > { %705 = vmatprep.subr.bf16.mxu0 %v780_v13 }
  0x51   : > { %706 = vmatpush3.bf16.msra.mxu0 %v781_v15 }
  0x52   : > { %707 = vmatprep.subr.bf16.mxu0 %v782_v16 }
  0x55   : > { %708 = vmatpush3.bf16.msra.mxu0 %v783_v17 }
  0x56   : > { %709 = vmatprep.subr.bf16.mxu0 %v784_v18 }
  0x59   : > { %710 = vmatpush3.bf16.msra.mxu0 %v785_v19 }
  0x5c   : > { %486 = vmatmul.mubr.bf16.vlgmr.msra.gmra.mxu0 %v786_v20 }
 0x11c   : > { %v711_v21 = vpop.f32.mrf.mxu0 }
 0x11e   : > { %v712_v23 = vpop.f32.mrf.mxu0 }
 0x11f   : > { %v713_v24 = vadd.f32 %v712_v23, %v711_v21 }
 0x120   : > { %v714_v25 = vpop.f32.mrf.mxu0 }
 0x121   : > { %v494_v26 = vadd.f32 %v713_v24, %v313_v22 }
 0x122   : > { %v715_v28 = vpop.f32.mrf.mxu0 }
 0x123   : > { %496 = vst [vmem:[#allocation2] sm:$0xff] %v494_v26  ;;  %v716_v29 = vadd.f32 %v715_v28, %v714_v25  ;;  %501 = sbr.rel (%p678_p6) target bundleno = 310 (0x136), region = 82 }
 0x125   : > { %v495_v30 = vadd.f32 %v716_v29, %v314_v27 }
 0x127   : > { %497 = vst [vmem:[#allocation2 + $0x8] sm:$0xff] %v495_v30 }
 0x128   : > { %v679_v33 = vld [vmem:[%s1015_s2] ss:$0 sm:$0xff] }
 0x12a   : > { %v502_v31 = vld [vmem:[#allocation2] sm:$0xff] }
 0x12b   : > { %v511_v34 = vadd.f32 %v679_v33, %v502_v31 }
 0x12d   : > { %v513_v36 = vmax.f32 %v511_v34, 0.0 }
 0x12e   : > { %v503_v32 = vld [vmem:[#allocation2 + $0x8] sm:$0xff] }
 0x12f   : > { %v512_v35 = vadd.f32 %v679_v33, %v503_v32 }
 0x131   : > { %v514_v37 = vmax.f32 %v512_v35, 0.0 }
 0x133   : > { %v693_v38 = vpack.c.bf16 %v514_v37, %v513_v36 }
 0x135   : > { %694 = vst [vmem:[%s1016_s3] sm:$0xff] %v693_v38  }
 0x136 PF: > { %s16_s17 = sadd.s32 1, %s865_s17   ;;  %s1019_s12 = smov %s849_s13 }
 0x137   : > { %p13_p7 = scmp.ge.s32.totalorder %s16_s17, 6   ;;  %s1020_s13 = smov %s853_s14 }
 0x138   : > { %s1021_s14 = smov %s939_s24  ;;  %s1022_s15 = smov %s861_s16 }
 0x139   : > { %s1023_s16 = smov %s1025_s19  ;;  %15 = sbr.rel (!%p13_p7) target bundleno = 4 (0x4), region = 129 }
 0x13e   :  { %553 = vsyncpa [#allocation5], 1 }
 0x13f   :  { %555 = vsyncpa [#allocation5 + $0x1], 1 }

// kernel: forward.3
= control target key start
LH: loop header
LB: loop body
LE: loop exit
PB: predicated region body
PF: predicated region fallthrough
CT: control target
= control target key end

     0   :  { %v212_v0 = vmov 0.0   ;;  %vm213_vm0 = vmmov 0   ;;  %s270_s1 = inlined_call_operand.vmem [shape: bf16[128,128], index: 1, kind: input, shape index: {}]   ;;  %s271_s0 = inlined_call_operand.vmem [shape: bf16[16,128], index: 0, kind: input, shape index: {}]   ;;  %s272_s2 = inlined_call_operand.vmem [shape: f32[1,128], index: 2, kind: input, shape index: {}]   ;;  %s273_s3 = inlined_call_operand.vmem [shape: f32[16,128], index: 3, kind: output, shape index: {}]  }
   0x1   :  { %181 = vmatprep.subr.bf16.mxu0 %v212_v0  ;;  %v203_v1 = vld [vmem:[%s270_s1 + $0x38] sm:$0xff]   ;;  %197 = vmatprep.mubr.msk.bf16.mxu0 %vm213_vm0, %v212_v0  ;;  %v204_v2 = vld [vmem:[%s270_s1 + $0x30] sm:$0xff]   ;;  %v205_v3 = vld [vmem:[%s270_s1 + $0x28] sm:$0xff]  }
   0x2   :  { %182 = vmatpush3.bf16.msra.mxu0 %v203_v1  ;;  %v206_v4 = vld [vmem:[%s270_s1 + $0x20] sm:$0xff]   ;;  %v207_v5 = vld [vmem:[%s270_s1 + $0x18] sm:$0xff]   ;;  %v208_v6 = vld [vmem:[%s270_s1 + $0x10] sm:$0xff]  }
   0x3   :  { %183 = vmatprep.subr.bf16.mxu0 %v212_v0  ;;  %v209_v7 = vld [vmem:[%s270_s1 + $0x8] sm:$0xff]   ;;  %v210_v8 = vld [vmem:[%s270_s1] sm:$0xff]  }
   0x4   :  { %v211_v9 = vld [vmem:[%s271_s0] sm:$0xff]  }
   0x5   :  { %v171_v10 = vld [vmem:[%s272_s2] ss:$0 sm:$0xff] }
   0x6   :  { %184 = vmatpush3.bf16.msra.mxu0 %v204_v2 }
   0x7   :  { %185 = vmatprep.subr.bf16.mxu0 %v212_v0 }
   0xa   :  { %186 = vmatpush3.bf16.msra.mxu0 %v205_v3 }
   0xb   :  { %187 = vmatprep.subr.bf16.mxu0 %v212_v0 }
   0xe   :  { %188 = vmatpush3.bf16.msra.mxu0 %v206_v4 }
   0xf   :  { %189 = vmatprep.subr.bf16.mxu0 %v212_v0 }
  0x12   :  { %190 = vmatpush3.bf16.msra.mxu0 %v207_v5 }
  0x13   :  { %191 = vmatprep.subr.bf16.mxu0 %v212_v0 }
  0x16   :  { %192 = vmatpush3.bf16.msra.mxu0 %v208_v6 }
  0x17   :  { %193 = vmatprep.subr.bf16.mxu0 %v212_v0 }
  0x1a   :  { %194 = vmatpush3.bf16.msra.mxu0 %v209_v7 }
  0x1b   :  { %195 = vmatprep.subr.bf16.mxu0 %v212_v0 }
  0x1e   :  { %196 = vmatpush3.bf16.msra.mxu0 %v210_v8 }
  0x21   :  { %198 = vmatmul.mubr.bf16.vlgmr.msra.gmra.mxu0 %v211_v9 }
  0xe1   :  { %v129_v11 = vpop.f32.mrf.mxu0 }
  0xe2   :  { %v152_v12 = vadd.f32 %v171_v10, %v129_v11 }
  0xe3   :  { %v199_v13 = vpop.f32.mrf.mxu0 }
  0xe4   :  { %v154_v14 = vmax.f32 %v152_v12, 0.0 }
  0xe5   :  { %v132_v15 = vpop.f32.mrf.mxu0 }
  0xe6   :  { %156 = vst [vmem:[%s273_s3] sm:$0xff] %v154_v14  ;;  %v153_v16 = vadd.f32 %v171_v10, %v132_v15 }
  0xe7   :  { %v200_v17 = vpop.f32.mrf.mxu0 }
  0xe8   :  { %v155_v18 = vmax.f32 %v153_v16, 0.0 }
  0xea   :  { %157 = vst [vmem:[%s273_s3 + $0x8] sm:$0xff] %v155_v18 }

</bundles_post_ra>
